<compile_context>
chip_gen: v6e
topology: v6e:2x2x1
jax: 0.10.0
libtpu: 0.0.40
codegen_flags: <defaults>
</compile_context>

<pallas_src>
import functools

import jax
import jax.numpy as jnp
from jax.experimental import pallas as pl
from jax.experimental.pallas import tpu as pltpu


def _round_up(x, m):
    return ((x + m - 1) // m) * m


# --------------------------------------------------------------------------------------
# Pallas kernels
# --------------------------------------------------------------------------------------
def _kT_kernel(x_ref, w_ref, b_ref, o_ref):
    # K tile = x @ Wk + bk, stored transposed (Cp, tile_m) so the attention matmul
    # contracts K^T's sublane dim (no per-query-tile XLU transposes downstream).
    k = jnp.dot(x_ref[...], w_ref[...], preferred_element_type=jnp.float32) + b_ref[...]
    o_ref[...] = jnp.transpose(k).astype(o_ref.dtype)


def _attn_logits_kernel(x_ref, wq_ref, bq_ref, kt_ref, o_ref, *, batch, hw, key_chunk, scale):
    # Fused: Q transform for this row tile, key-tiled Q @ K^T, per-key-batch max over
    # positions, mean over batches, * 1/sqrt(C).  Scores never leave VMEM and the live
    # score block is only (tile_m, key_chunk).
    q = jnp.dot(x_ref[...], wq_ref[...], preferred_element_type=jnp.float32)
    q = (q + bq_ref[...]).astype(kt_ref.dtype)
    acc = None
    for b in range(batch):                              # B is tiny -> static unroll
        mb = None
        for c0 in range(0, hw, key_chunk):              # fixed key tiles within a batch
            s = jnp.dot(q, kt_ref[:, b * hw + c0:b * hw + c0 + key_chunk],
                        preferred_element_type=jnp.float32)
            m = jnp.max(s, axis=-1, keepdims=True)
            mb = m if mb is None else jnp.maximum(mb, m)
        acc = mb if acc is None else acc + mb
    o_ref[...] = acc * (scale / batch)                  # single epilogue (tile_m,1) store


def _scale_matmul_bias_kernel(x_ref, w_ref, b_ref, a_ref, o_ref):
    # o = (x * a_row) @ w + b : attention scaling fused into the conv6 matmul.
    # bf16 * bf16 column broadcast directly (no f32 round-trip over the whole tile).
    xs = x_ref[...] * a_ref[...]
    acc = jnp.dot(xs, w_ref[...], preferred_element_type=jnp.float32)
    o_ref[...] = (acc + b_ref[...]).astype(o_ref.dtype)


# --------------------------------------------------------------------------------------
# Module forward
# --------------------------------------------------------------------------------------
def gam_forward(x, params, *, tile_m=256, key_chunk=2048,
                vmem_limit_bytes=48 * 1024 * 1024,
                out_dtype=jnp.float32, nhwc_out=False):
    """x: (B, C, H, W) f32.  params: 1x1-conv weights (C_out, C_in) + biases (C,).

    tile_m: row-tile size (multiple of 128).  v6e/v5e: raise to 512-1024 for large
    shapes; v7x: keep the resulting grid-step count even so both TCs get work.
    out_dtype: set to jnp.bfloat16 (and nhwc_out=True) if the consumer allows it to
    halve the output write bandwidth and drop the NHWC->NCHW transpose pass.
    """
    B, C, H, W = x.shape
    HW = H * W
    M = B * HW
    scale = 1.0 / (C ** 0.5)

    Cp = _round_up(C, 128)                       # lane-dense channel dim
    # tile_m is the lane dim of the K^T output tiles -> must be a multiple of 128
    # (this also satisfies bf16 sublane packing, 16, for the row tiles).
    tile_m = max(128, min(_round_up(tile_m, 128), _round_up(M, 128)))
    Mp = _round_up(M, tile_m)
    n_tiles = Mp // tile_m

    # Key chunk inside the attention kernel: lane-aligned divisor of HW (falls back to
    # the whole batch-row when HW is small / not divisible).
    kc = key_chunk if (HW > key_chunk and HW % key_chunk == 0) else HW
    # TODO(synk): for HW not a multiple of 128 the static key slices stay correct but
    # may materialize VMEM copies; pad HW per-batch if that case ever matters.

    # ---- layout: NCHW -> (B*HW, Cp) row-major, bf16 operands ----
    x_mat = jnp.transpose(x, (0, 2, 3, 1)).reshape(M, C)
    x_mat = jnp.pad(x_mat, ((0, Mp - M), (0, Cp - C))).astype(jnp.bfloat16)

    def pad_w(w):   # (C_out, C_in) -> (Cp, Cp) so that rows @ w == conv1x1
        return jnp.pad(w.T, ((0, Cp - C), (0, Cp - C))).astype(jnp.bfloat16)

    def pad_b(b):
        return jnp.pad(b, (0, Cp - C)).astype(jnp.float32).reshape(1, Cp)

    wq, wk, wc = pad_w(params["wq"]), pad_w(params["wk"]), pad_w(params["wc"])
    bq, bk, bc = pad_b(params["bq"]), pad_b(params["bk"]), pad_b(params["bc"])

    cparams = pltpu.CompilerParams(
        dimension_semantics=("parallel",),
        vmem_limit_bytes=vmem_limit_bytes)

    # Constant-index blocks are revisited every grid step: single-buffer them
    # (double-buffering buys zero overlap but doubles their VMEM footprint).
    const = pl.Buffered(1)
    row_spec = pl.BlockSpec((tile_m, Cp), lambda i: (i, 0))
    w_spec = pl.BlockSpec((Cp, Cp), lambda i: (0, 0), pipeline_mode=const)
    b_spec = pl.BlockSpec((1, Cp), lambda i: (0, 0), pipeline_mode=const)
    kt_spec = pl.BlockSpec((Cp, Mp), lambda i: (0, 0), pipeline_mode=const)
    col1_spec = pl.BlockSpec((tile_m, 1), lambda i: (i, 0))

    # ---- 1) key transform, stored transposed: K^T = (X @ Wk + bk)^T  (bf16) ----
    k_t = pl.pallas_call(
        _kT_kernel,
        out_shape=jax.ShapeDtypeStruct((Cp, Mp), jnp.bfloat16),
        grid=(n_tiles,),
        in_specs=[row_spec, w_spec, b_spec],
        out_specs=pl.BlockSpec((Cp, tile_m), lambda i: (0, i)),
        compiler_params=cparams,
    )(x_mat, wk, bk)

    # ---- 2) fused Q transform + key-tiled Q@K^T + max/mean/scale -> per-row logits ----
    # K^T stays resident (single-buffered) in VMEM across the query-row grid.
    logits = pl.pallas_call(
        functools.partial(_attn_logits_kernel, batch=B, hw=HW, key_chunk=kc, scale=scale),
        out_shape=jax.ShapeDtypeStruct((Mp, 1), jnp.float32),
        grid=(n_tiles,),
        in_specs=[row_spec, w_spec, b_spec, kt_spec],
        out_specs=col1_spec,
        compiler_params=cparams,
    )(x_mat, wq, bq, k_t)

    # ---- 3) softmax over positions per batch: tiny (B, HW) array -> plain JAX ----
    attn = jax.nn.softmax(logits[:M, 0].reshape(B, HW), axis=-1)
    attn_rows = jnp.pad(attn.reshape(M, 1), ((0, Mp - M), (0, 0))).astype(jnp.bfloat16)

    # ---- 4) conv6 fused with the attention scaling, lane-dense (Mp, Cp) output ----
    out_mat = pl.pallas_call(
        _scale_matmul_bias_kernel,
        out_shape=jax.ShapeDtypeStruct((Mp, Cp), out_dtype),
        grid=(n_tiles,),
        in_specs=[row_spec, w_spec, b_spec, col1_spec],
        out_specs=row_spec,
        compiler_params=cparams,
    )(x_mat, wc, bc, attn_rows)

    out = out_mat[:M, :C].reshape(B, H, W, C)
    return out if nhwc_out else out.transpose(0, 3, 1, 2)


# --------------------------------------------------------------------------------------
# Params + pure-JAX reference (mirrors the PyTorch forward exactly, all f32)
# --------------------------------------------------------------------------------------
def init_params(key, channel_in):
    ks = jax.random.split(key, 6)
    bound = 1.0 / (channel_in ** 0.5)       # PyTorch Conv2d default (kaiming-uniform-ish)
    u = lambda k, shape: jax.random.uniform(k, shape, jnp.float32, -bound, bound)
    return {
        "wq": u(ks[0], (channel_in, channel_in)), "bq": u(ks[1], (channel_in,)),
        "wk": u(ks[2], (channel_in, channel_in)), "bk": u(ks[3], (channel_in,)),
        "wc": u(ks[4], (channel_in, channel_in)), "bc": u(ks[5], (channel_in,)),
    }


def gam_reference(x, p):
    B, C, H, W = x.shape
    HW = H * W
    scale = 1.0 / (C ** 0.5)

    def conv1x1(z, w, b):
        return jnp.einsum("bihw,oi->bohw", z, w) + b[None, :, None, None]

    q = conv1x1(x, p["wq"], p["bq"]).reshape(B, C, HW)
    q = jnp.transpose(q, (0, 2, 1)).reshape(B * HW, C)
    k = conv1x1(x, p["wk"], p["bk"]).reshape(B, C, HW)
    k = jnp.transpose(k, (1, 0, 2)).reshape(C, B * HW)
    s = q @ k
    s = s.reshape(B * HW, B, HW)
    s = jnp.max(s, axis=-1)
    s = jnp.mean(s, axis=-1)
    s = jax.nn.softmax(s.reshape(B, HW) * scale, axis=-1)
    xw = x * s.reshape(B, 1, H, W)
    return conv1x1(xw, p["wc"], p["bc"])


if __name__ == "__main__":
    key = jax.random.PRNGKey(0)
    kx, kp = jax.random.split(key)

    # Small shapes (channel_in=512 in the original module; 32 here for the demo).
    # NOTE: padding C to 128 lanes makes the demo wider than needed; perf conclusions
    # should be drawn at the production C=512 shape where Cp == C.
    B, C, H, W = 2, 32, 16, 16
    x = jax.random.normal(kx, (B, C, H, W), jnp.float32)
    params = init_params(kp, C)

    out = gam_forward(x, params)
    out = jax.block_until_ready(out)
    assert out.shape == (B, C, H, W)

    ref = gam_reference(x, params)
    # TODO(synk): at production C=512, re-validate the bf16 Q/K rounding in the logits
    # against an f32 reference tolerance before shipping.
    assert jnp.allclose(out, ref, atol=2e-2, rtol=2e-2), float(jnp.max(jnp.abs(out - ref)))

    print("KERNEL_OK")
</pallas_src>

<mosaic_0001>
module attributes {stable_mosaic.version = 11 : i64} {
  func.func @_kT_kernel(%arg0: i32, %arg1: memref<256x128xbf16, #tpu.memory_space<vmem>>, %arg2: memref<128x128xbf16, #tpu.memory_space<vmem>>, %arg3: memref<1x128xf32, #tpu.memory_space<vmem>>, %arg4: memref<128x256xbf16, #tpu.memory_space<vmem>>) attributes {dimension_semantics = [#tpu.dimension_semantics<parallel>], iteration_bounds = array<i64: 2>, scalar_prefetch = 0 : i64, scratch_operands = 0 : i64, tpu.core_type = #tpu.core_type<tc>, window_params = [{transform_indices = @transform_0, window_bounds = array<i64: 256, 128>}, {pipeline_mode = #tpu.pipeline_mode<synchronous>, transform_indices = @transform_1, window_bounds = array<i64: 128, 128>}, {pipeline_mode = #tpu.pipeline_mode<synchronous>, transform_indices = @transform_2, window_bounds = array<i64: 1, 128>}, {transform_indices = @transform_3, window_bounds = array<i64: 128, 256>}]} {
    %c0 = arith.constant 0 : index
    %c0_0 = arith.constant 0 : index
    %0 = vector.load %arg1[%c0, %c0_0] : memref<256x128xbf16, #tpu.memory_space<vmem>>, vector<256x128xbf16>
    %c0_1 = arith.constant 0 : index
    %c0_2 = arith.constant 0 : index
    %1 = vector.load %arg2[%c0_1, %c0_2] : memref<128x128xbf16, #tpu.memory_space<vmem>>, vector<128x128xbf16>
    %cst = arith.constant dense<0.000000e+00> : vector<256x128xf32>
    %2 = tpu.matmul %0, %1, %cst {dimension_numbers = #tpu.dot_dimension_numbers<[1], [0], [0], [1], [0, 0, 1, 1], [], []>} : vector<256x128xbf16>, vector<128x128xbf16>, vector<256x128xf32> -> vector<256x128xf32>
    %c0_3 = arith.constant 0 : index
    %c0_4 = arith.constant 0 : index
    %3 = vector.load %arg3[%c0_3, %c0_4] : memref<1x128xf32, #tpu.memory_space<vmem>>, vector<1x128xf32>
    %4 = vector.broadcast %3 : vector<1x128xf32> to vector<256x128xf32>
    %5 = arith.addf %2, %4 : vector<256x128xf32>
    %6 = tpu.transpose %5, [1, 0] : vector<256x128xf32> -> vector<128x256xf32>
    %7 = arith.truncf %6 : vector<128x256xf32> to vector<128x256xbf16>
    %c0_5 = arith.constant 0 : index
    %c0_6 = arith.constant 0 : index
    %8 = vector.load %arg4[%c0_5, %c0_6] : memref<128x256xbf16, #tpu.memory_space<vmem>>, vector<128x256xbf16>
    tpu.vector_store %arg4[%c0_5, %c0_6], %7 {strides = array<i32>} : memref<128x256xbf16, #tpu.memory_space<vmem>>, vector<128x256xbf16>,
    return
  }
  func.func @transform_0(%arg0: i32) -> (i32, i32) {
    %c0_i32 = arith.constant 0 : i32
    %c0_i32_0 = arith.constant 0 : i32
    return %arg0, %c0_i32 : i32, i32
  }
  func.func @transform_1(%arg0: i32) -> (i32, i32) {
    %c0_i32 = arith.constant 0 : i32
    %c0_i32_0 = arith.constant 0 : i32
    %c0_i32_1 = arith.constant 0 : i32
    return %c0_i32, %c0_i32_0 : i32, i32
  }
  func.func @transform_2(%arg0: i32) -> (i32, i32) {
    %c0_i32 = arith.constant 0 : i32
    %c0_i32_0 = arith.constant 0 : i32
    %c0_i32_1 = arith.constant 0 : i32
    return %c0_i32, %c0_i32_0 : i32, i32
  }
  func.func @transform_3(%arg0: i32) -> (i32, i32) {
    %c0_i32 = arith.constant 0 : i32
    %c0_i32_0 = arith.constant 0 : i32
    return %c0_i32, %arg0 : i32, i32
  }
}

</mosaic_0001>

<bundles_post_ra>
// kernel: tpu_custom_call.1
= control target key start
LH: loop header
LB: loop body
LE: loop exit
PB: predicated region body
PF: predicated region fallthrough
CT: control target
= control target key end

     0   :  { %8 = vsyncpa [#allocation3], 0  ;;  %s1614_s0 = inlined_call_operand.hbm [shape: bf16[512,128], index: 0, kind: input, shape index: {}]   ;;  %s1615_s1 = inlined_call_operand.hbm [shape: bf16[128,128], index: 1, kind: input, shape index: {}]   ;;  %s1616_s2 = inlined_call_operand.vmem [shape: f32[1,128], index: 2, kind: input, shape index: {}]   ;;  %s1617_s3 = inlined_call_operand.hbm [shape: bf16[128,512], index: 3, kind: output, shape index: {}]  }
   0x1   :  { %10 = vsyncpa [#allocation3 + $0x1], 0 }
   0x2   :  { %11 = vsyncpa [#allocation6], 0 }
   0x3   :  { %12 = vsyncpa [#allocation4], 0 }
   0x4   :  { %14 = vsyncpa [#allocation4 + $0x1], 0  ;;  %s1353_s12 = smov 0   ;;  %s1355_s13 = smov 0  }
   0x5   :  { %s1357_s14 = smov 0   ;;  %s1359_s15 = smov 0  }
   0x6 LB: > { %s1374_s16 = sadd.s32 4294967295, %s1323_s15   ;;  %s840_s17 = sadd.s32 4294967294, %s1323_s15   ;;  %s1323_s15 = sphi %s1359_s15, %s1639_s15   ;;  %s1319_s14 = sphi %s1357_s14, %s1638_s14   ;;  %s1315_s13 = sphi %s1355_s13, %s1637_s13   ;;  %s1311_s12 = sphi %s1353_s12, %s1636_s12  }
   0x7   : > { %p40_p0 = scmp.ne.s32.totalorder %s1315_s13, %s1311_s12  ;;  %p1618_p1 = scmp.eq.s32.totalorder %s1374_s16, 0 }
   0x8   : > { %p112_p3 = scmp.eq.s32.totalorder %s840_s17, 1  ;;  %p841_p5 = scmp.ge.s32.totalorder %s1323_s15, 1 }
   0x9   : > { %p1383_p4 = por %p1618_p1, %p40_p0  ;;  %p119_p7 = scmp.lt.s32.totalorder %s1323_s15, 3 }
   0xa   : > { %p1388_p6 = por %p112_p3, %p40_p0  ;;  %s1325_s21 = smov [#allocation5]  }
   0xb   : > { %s1622_s18 = scalar_select %p1383_p4, 1, 0 }
   0xc   : > { %s1623_s19 = scalar_select %p1388_p6, 1, 0 }
   0xd   : > { %p1393_p8 = pnand %p841_p5, %p119_p7  ;;  %s131_s22 = sshll.u32 %s1325_s21, 4  ;;  %s132_s22 = int_to_ptr.vmem [resolvable:$true] %s131_s22 }
   0xe   : > { %s1407_s24 = sadd.s32 1, %s1323_s15   ;;  %s27_s25 = sadd.s32 1, %s1319_s14 }
   0xf   : > { %s1624_s20 = scalar_select %p1393_p8, 1, 0 }
  0x10   : > { %p1011_p9 = pneg %p1393_p8  ;;  %s24_s26 = ssub.s32 %s1323_s15, %s1407_s24 }
  0x11   : > { %s1212_s27 = scalar_lea.vmem %s132_s22, 1024  ;;  %p1220_p5 = scmp.lt.s32.totalorder %s132_s22, %s132_s22 }
  0x12   : > { %p1402_p11 = pnand %p1011_p9, %p1618_p1  ;;  %p1213_p13 = scmp.ne.s32.totalorder %s132_s22, %s1212_s27 }
  0x13   : > { %p1221_p7 = scmp.lt.s32.totalorder %s1212_s27, %s1212_s27 }
  0x14   : > { %p1203_p12 = pneg %p1402_p11 }
  0x15   : > { %p1222_p10 = por %p1221_p7, %p1220_p5 }
  0x16   : > { %p1215_p0 = pnand %p1213_p13, %p1203_p12 }
  0x18   : > { %p1216_p3 = pneg %p1215_p0 }
  0x1a   : > { %p1223_p2 = pnand %p1222_p10, %p1216_p3 }
  0x1c   : > { %1226 = shalt.err (!%p1223_p2)
}
  0x1d   : > { %s1326_s28 = smov 64   ;;  %s1327_s29 = smov 4  }
  0x1e   : > { %1014 = dma.hbm_to_vmem [thread:$0]  (!%p1402_p11), %s1615_s1, 1024, %s132_s22, [#allocation6], %s1326_s28, %s1326_s28, %s1327_s29  }
  0x1f   : > { %p25_p2 = scmp.eq.s32.totalorder %s24_s26, 0  ;;  %p34_p9 = scmp.ne.s32.totalorder %s1319_s14, %s1315_s13 }
  0x20   : > { %p35_p10 = scmp.eq.s32.totalorder %s1323_s15, 0  ;;  %p1024_p12 = scmp.lt.s32.totalorder %s1323_s15, 2 }
  0x21   : > { %s1427_s5 = scalar_select %p25_p2, %s1319_s14, %s27_s25  }
  0x22   : > { %p36_p13 = por %p35_p10, %p34_p9  ;;  %p1626_p0 = scmp.eq.s32.totalorder %s1374_s16, 1 }
  0x23   : > { %s148_s7 = sand.u32 1, %s1319_s14   ;;  %s897_s8 = sshll.u32 %s1323_s15, 11 }
  0x24   : > { %p1431_p3 = por %p1626_p0, %p34_p9  ;;  %s844_s9 = sshll.u32 %s148_s7, 7 }
  0x25   : > { %s1440_s17 = scalar_lea.hbm %s1614_s0, %s897_s8  ;;  %s152_s21 = scalar_lea.vmem [#allocation2], %s844_s9 }
  0x26   : > { %s1627_s6 = scalar_select %p1431_p3, 1, 0 }
  0x27   : > { %s159_s22 = sshll.u32 %s152_s21, 4  ;;  %p1442_p11 = pnand %p1024_p12, %p36_p13  ;;  %s1446_s22 = int_to_ptr.vmem [resolvable:$true] %s159_s22 }
  0x28   : > { %s1448_s25 = scalar_lea.sflag [#allocation3], %s148_s7  ;;  %s1227_s26 = scalar_lea.hbm %s1440_s17, 2048 }
  0x29   : > { %p1228_p5 = scmp.ne.s32.totalorder %s1440_s17, %s1227_s26  ;;  %p1229_p7 = pneg %p1442_p11 }
  0x2a   : > { %s1232_s4 = scalar_lea.hbm %s1614_s0, 4096  ;;  %p1233_p10 = scmp.lt.s32.totalorder %s1440_s17, %s1614_s0 }
  0x2b   : > { %p1230_p2 = pnand %p1229_p7, %p1228_p5  ;;  %p1234_p12 = scmp.lt.s32.totalorder %s1232_s4, %s1227_s26 }
  0x2d   : > { %p1231_p9 = pneg %p1230_p2  ;;  %p1235_p13 = por %p1234_p12, %p1233_p10 }
  0x2f   : > { %p1236_p0 = pnand %p1235_p13, %p1231_p9 }
  0x31   : > { %1239 = shalt.err (!%p1236_p0)
}
  0x32   : > { %s1240_s7 = scalar_lea.vmem %s1446_s22, 2048  ;;  %s1328_s10 = smov [#allocation2]  }
  0x33   : > { %p1241_p1 = scmp.ne.s32.totalorder %s1446_s22, %s1240_s7  ;;  %s1245_s11 = sshll.u32 %s1328_s10, 4  ;;  %s1246_s11 = int_to_ptr.vmem [resolvable:$false] %s1245_s11 }
  0x34   : > { %s1247_s21 = scalar_lea.vmem %s1246_s11, 4096  ;;  %p1248_p2 = scmp.lt.s32.totalorder %s1446_s22, %s1246_s11 }
  0x35   : > { %p1243_p6 = pnand %p1241_p1, %p1229_p7  ;;  %p1249_p3 = scmp.lt.s32.totalorder %s1247_s21, %s1240_s7 }
  0x37   : > { %p1244_p5 = pneg %p1243_p6  ;;  %p1250_p4 = por %p1249_p3, %p1248_p2 }
  0x39   : > { %p1251_p8 = pnand %p1250_p4, %p1244_p5 }
  0x3b   : > { %1254 = shalt.err (!%p1251_p8)
}
  0x3c   : > { %1018 = dma.hbm_to_vmem [thread:$0]  (!%p1442_p11), %s1440_s17, 2048, %s1446_s22, %s1448_s25, %s1326_s28, %s1326_s28, %s1327_s29  }
  0x3d   : > { %p1629_p1 = scmp.ne.s32.totalorder %s1624_s20, 0 }
  0x3e   : > { %s1475_s26 = sand.u32 (!%p1629_p1), 1, %s1315_s13   ;;  %p1630_p4 = scmp.ne.s32.totalorder (!%p1629_p1), %s1622_s18, 0 }
  0x3f   : > { %171 = sbr.rel (%p1629_p1) target bundleno = 508 (0x1fc), region = 32  ;;  %s848_s27 = sshll.u32 (!%p1629_p1), %s1475_s26, 7 }
  0x40   : > { %s174_s30 = scalar_lea.sflag (!%p1629_p1), [#allocation3], %s1475_s26  ;;  %s1481_s23 = scalar_lea.vmem (!%p1629_p1), [#allocation2], %s848_s27 }
  0x44   : > { %1298 = dma.done.wait (%p1630_p4), %s174_s30, 2048  }
  0x45   : > { %1300 = vsyncadd (%p1630_p4), %s174_s30, 4294965248  ;;  %p1631_p6 = scmp.eq.s32.totalorder %s1374_s16, 0 }
  0x47   : > { %1302 = dma.done.wait (%p1631_p6), [#allocation6], 1024   ;;  %p1632_p8 = pmov %p1631_p6 }
  0x48   : > { %v1177_v0 = vld [vmem:[#allocation5 + $0x38] sm:$0xff]   ;;  %v1178_v1 = vld [vmem:[#allocation5 + $0x30] sm:$0xff]   ;;  %v1179_v2 = vld [vmem:[#allocation5 + $0x28] sm:$0xff]   ;;  %s1546_s28 = scalar_lea.vmem [#allocation7], %s848_s27  ;;  %s914_s29 = sshll.u32 %s1374_s16, 7 }
  0x49   : > { %1304 = vsyncadd (%p1632_p8), [#allocation6], 4294966272  ;;  %939 = vmatprep.subr.bf16.mxu0 %v1177_v0  ;;  %987 = vmatprep.subr.bf16.mxu1 %v1177_v0  ;;  %v1180_v3 = vld [vmem:[#allocation5 + $0x20] sm:$0xff]   ;;  %v1181_v6 = vld [vmem:[#allocation5 + $0x18] sm:$0xff]   ;;  %s757_s17 = sshll.u32 %s1546_s28, 4  ;;  %s1568_s4 = scalar_lea.hbm %s1617_s3, %s914_s29  ;;  %s1570_s17 = int_to_ptr.vmem [resolvable:$true] %s757_s17 }
  0x4a   : > { %940 = vmatpush3.bf16.msra.mxu0 %v1177_v0  ;;  %995 = vmatpush3.bf16.msra.mxu1 %v1177_v0  ;;  %v1185_v4 = vld [vmem:[%s1481_s23] sm:$0xff]   ;;  %v1182_v7 = vld [vmem:[#allocation5 + $0x10] sm:$0xff]   ;;  %v1183_v8 = vld [vmem:[#allocation5 + $0x8] sm:$0xff]   ;;  %s744_s8 = scalar_lea.sflag [#allocation4], %s1475_s26  ;;  %s1255_s16 = scalar_lea.vmem %s1570_s17, 2048 }
  0x4b   : > { %941 = vmatprep.subr.bf16.mxu0 %v1178_v1  ;;  %988 = vmatprep.subr.bf16.mxu1 %v1178_v1  ;;  %v1186_v5 = vld [vmem:[%s1481_s23 + $0x40] sm:$0xff]   ;;  %v1187_v10 = vld [vmem:[%s1481_s23 + $0x8] sm:$0xff]   ;;  %v1189_v12 = vld [vmem:[%s1481_s23 + $0x10] sm:$0xff]   ;;  %p1256_p3 = scmp.ne.s32.totalorder %s1570_s17, %s1255_s16  ;;  %p1633_p11 = scmp.ne.s32.totalorder %s1627_s6, 0 }
  0x4c   : > { %955 = vmatprep.mubr.bf16.mxu0 %v1185_v4  ;;  %971 = vmatprep.mubr.bf16.mxu1 %v1186_v5  ;;  %v1184_v9 = vld [vmem:[#allocation5] sm:$0xff]   ;;  %v1188_v11 = vld [vmem:[%s1481_s23 + $0x48] sm:$0xff]   ;;  %v1190_v13 = vld [vmem:[%s1481_s23 + $0x50] sm:$0xff]   ;;  %s1329_s9 = smov [#allocation7]  }
  0x4d   : > { %v1191_v14 = vld [vmem:[%s1481_s23 + $0x18] sm:$0xff]   ;;  %v1193_v16 = vld [vmem:[%s1481_s23 + $0x20] sm:$0xff]   ;;  %v1195_v18 = vld [vmem:[%s1481_s23 + $0x28] sm:$0xff]   ;;  %p1257_p7 = pnand %p1256_p3, %p1633_p11  ;;  %s1259_s7 = sshll.u32 %s1329_s9, 4  ;;  %s1260_s7 = int_to_ptr.vmem [resolvable:$false] %s1259_s7 }
  0x4e   : > { %942 = vmatpush3.bf16.msra.mxu0 %v1178_v1  ;;  %996 = vmatpush3.bf16.msra.mxu1 %v1178_v1  ;;  %v1192_v15 = vld [vmem:[%s1481_s23 + $0x58] sm:$0xff]   ;;  %v1194_v17 = vld [vmem:[%s1481_s23 + $0x60] sm:$0xff]   ;;  %v1196_v19 = vld [vmem:[%s1481_s23 + $0x68] sm:$0xff]   ;;  %s1261_s10 = scalar_lea.vmem %s1260_s7, 4096  ;;  %p1262_p10 = scmp.lt.s32.totalorder %s1570_s17, %s1260_s7 }
  0x4f   : > { %943 = vmatprep.subr.bf16.mxu0 %v1179_v2  ;;  %989 = vmatprep.subr.bf16.mxu1 %v1179_v2  ;;  %v1197_v20 = vld [vmem:[%s1481_s23 + $0x30] sm:$0xff]   ;;  %v1199_v22 = vld [vmem:[%s1481_s23 + $0x38] sm:$0xff]   ;;  %v1510_v26 = vld [vmem:[%s1616_s2] ss:$0 sm:$0xff]  ;;  %p1258_p9 = pneg %p1257_p7  ;;  %p1263_p12 = scmp.lt.s32.totalorder %s1261_s10, %s1255_s16 }
  0x50   : > { %v1198_v21 = vld [vmem:[%s1481_s23 + $0x70] sm:$0xff]   ;;  %v1200_v23 = vld [vmem:[%s1481_s23 + $0x78] sm:$0xff]  }
  0x51   : > { %p1264_p13 = por %p1263_p12, %p1262_p10 }
  0x52   : > { %944 = vmatpush3.bf16.msra.mxu0 %v1179_v2  ;;  %997 = vmatpush3.bf16.msra.mxu1 %v1179_v2 }
  0x53   : > { %945 = vmatprep.subr.bf16.mxu0 %v1180_v3  ;;  %990 = vmatprep.subr.bf16.mxu1 %v1180_v3  ;;  %p1265_p0 = pnand %p1264_p13, %p1258_p9 }
  0x56   : > { %946 = vmatpush3.bf16.msra.mxu0 %v1180_v3  ;;  %998 = vmatpush3.bf16.msra.mxu1 %v1180_v3 }
  0x57   : > { %947 = vmatprep.subr.bf16.mxu0 %v1181_v6  ;;  %991 = vmatprep.subr.bf16.mxu1 %v1181_v6 }
  0x5a   : > { %948 = vmatpush3.bf16.msra.mxu0 %v1181_v6  ;;  %999 = vmatpush3.bf16.msra.mxu1 %v1181_v6 }
  0x5b   : > { %949 = vmatprep.subr.bf16.mxu0 %v1182_v7  ;;  %992 = vmatprep.subr.bf16.mxu1 %v1182_v7 }
  0x5e   : > { %950 = vmatpush3.bf16.msra.mxu0 %v1182_v7  ;;  %1000 = vmatpush3.bf16.msra.mxu1 %v1182_v7 }
  0x5f   : > { %951 = vmatprep.subr.bf16.mxu0 %v1183_v8  ;;  %993 = vmatprep.subr.bf16.mxu1 %v1183_v8 }
  0x62   : > { %952 = vmatpush3.bf16.msra.mxu0 %v1183_v8  ;;  %1001 = vmatpush3.bf16.msra.mxu1 %v1183_v8 }
  0x63   : > { %953 = vmatprep.subr.bf16.mxu0 %v1184_v9  ;;  %994 = vmatprep.subr.bf16.mxu1 %v1184_v9 }
  0x66   : > { %954 = vmatpush3.bf16.msra.mxu0 %v1184_v9  ;;  %1002 = vmatpush3.bf16.msra.mxu1 %v1184_v9 }
  0x69   : > { %956 = vmatmul.mubr.bf16.vlgmr.msra.gmra.mxu0 %v1187_v10  ;;  %972 = vmatmul.mubr.bf16.vlgmr.msra.gmra.mxu1 %v1188_v11 }
  0x6a   : > { %959 = vmatprep.mubr.bf16.mxu0 %v1189_v12  ;;  %975 = vmatprep.mubr.bf16.mxu1 %v1190_v13 }
  0x71   : > { %960 = vmatmul.mubr.bf16.gmra.mxu0 %v1191_v14  ;;  %976 = vmatmul.mubr.bf16.gmra.mxu1 %v1192_v15 }
  0x72   : > { %963 = vmatprep.mubr.bf16.mxu0 %v1193_v16  ;;  %979 = vmatprep.mubr.bf16.mxu1 %v1194_v17 }
  0x79   : > { %964 = vmatmul.mubr.bf16.gmra.mxu0 %v1195_v18  ;;  %980 = vmatmul.mubr.bf16.gmra.mxu1 %v1196_v19 }
  0x7a   : > { %967 = vmatprep.mubr.bf16.mxu0 %v1197_v20  ;;  %983 = vmatprep.mubr.bf16.mxu1 %v1198_v21 }
  0x81   : > { %968 = vmatmul.mubr.bf16.gmra.mxu0 %v1199_v22  ;;  %984 = vmatmul.mubr.bf16.gmra.mxu1 %v1200_v23 }
 0x129   : > { %v957_v24 = vpop.f32.mrf.mxu0  ;;  %v973_v25 = vpop.f32.mrf.mxu1 }
 0x12a   : > { %v449_v40 = vadd.f32 %v957_v24, %v1510_v26  ;;  %v513_v41 = vadd.f32 %v973_v25, %v1510_v26 }
 0x12b   : > { %v440_v27 = vpop.f32.mrf.mxu0  ;;  %v504_v28 = vpop.f32.mrf.mxu1 }
 0x12c   : > { %v441_v29 = vadd.f32 %v1510_v26, %v440_v27  ;;  %v505_v30 = vadd.f32 %v1510_v26, %v504_v28  ;;  %v1069_v47 = vpack.i.bf16 %v513_v41, %v449_v40 }
 0x12d   : > { %v958_v31 = vpop.f32.mrf.mxu0  ;;  %v974_v32 = vpop.f32.mrf.mxu1 }
 0x12e   : > { %v1065_v33 = vpack.i.bf16 %v505_v30, %v441_v29  ;;  %v452_v45 = vadd.f32 %v958_v31, %v1510_v26  ;;  %v516_v46 = vadd.f32 %v974_v32, %v1510_v26 }
 0x12f   : > { %v443_v34 = vpop.f32.mrf.mxu0  ;;  %v507_v35 = vpop.f32.mrf.mxu1 }
 0x130   : > { %v444_v36 = vadd.f32 %v1510_v26, %v443_v34  ;;  %v508_v37 = vadd.f32 %v1510_v26, %v507_v35  ;;  %1066 = vxpose.xlu0.b32.start [1/16] %v1065_v33, 128  ;;  %v1071_v52 = vpack.i.bf16 %v516_v46, %v452_v45 }
 0x131   : > { %v961_v38 = vpop.f32.mrf.mxu0  ;;  %v977_v39 = vpop.f32.mrf.mxu1 }
 0x132   : > { %v1067_v42 = vpack.i.bf16 %v508_v37, %v444_v36  ;;  %v465_v60 = vadd.f32 %v961_v38, %v1510_v26  ;;  %v529_v61 = vadd.f32 %v977_v39, %v1510_v26 }
 0x133   : > { %v456_v43 = vpop.f32.mrf.mxu0  ;;  %v520_v44 = vpop.f32.mrf.mxu1 }
 0x134   : > { %1068 = vxpose.xlu0.b32.cont [2/16] %v1067_v42, 128  ;;  %v457_v50 = vadd.f32 %v1510_v26, %v456_v43  ;;  %v521_v51 = vadd.f32 %v1510_v26, %v520_v44  ;;  %v1077_v3 = vpack.i.bf16 %v529_v61, %v465_v60 }
 0x135   : > { %v962_v48 = vpop.f32.mrf.mxu0  ;;  %v978_v49 = vpop.f32.mrf.mxu1 }
 0x136   : > { %v1073_v57 = vpack.i.bf16 %v521_v51, %v457_v50  ;;  %v468_v1 = vadd.f32 %v962_v48, %v1510_v26  ;;  %v532_v2 = vadd.f32 %v978_v49, %v1510_v26 }
 0x137   : > { %v459_v53 = vpop.f32.mrf.mxu0  ;;  %v523_v54 = vpop.f32.mrf.mxu1 }
 0x138   : > { %1070 = vxpose.xlu0.b32.cont [3/16] %v1069_v47, 128  ;;  %v460_v55 = vadd.f32 %v1510_v26, %v459_v53  ;;  %v524_v56 = vadd.f32 %v1510_v26, %v523_v54  ;;  %v1079_v8 = vpack.i.bf16 %v532_v2, %v468_v1 }
 0x139   : > { %v965_v58 = vpop.f32.mrf.mxu0  ;;  %v981_v59 = vpop.f32.mrf.mxu1 }
 0x13a   : > { %v1075_v62 = vpack.i.bf16 %v524_v56, %v460_v55  ;;  %v481_v16 = vadd.f32 %v965_v58, %v1510_v26  ;;  %v545_v17 = vadd.f32 %v981_v59, %v1510_v26 }
 0x13b   : > { %v472_v63 = vpop.f32.mrf.mxu0  ;;  %v536_v0 = vpop.f32.mrf.mxu1 }
 0x13c   : > { %1072 = vxpose.xlu0.b32.cont [4/16] %v1071_v52, 128  ;;  %v473_v6 = vadd.f32 %v1510_v26, %v472_v63  ;;  %v537_v7 = vadd.f32 %v1510_v26, %v536_v0  ;;  %v1085_v23 = vpack.i.bf16 %v545_v17, %v481_v16 }
 0x13d   : > { %v966_v4 = vpop.f32.mrf.mxu0  ;;  %v982_v5 = vpop.f32.mrf.mxu1 }
 0x13e   : > { %v1081_v13 = vpack.i.bf16 %v537_v7, %v473_v6  ;;  %v484_v21 = vadd.f32 %v966_v4, %v1510_v26  ;;  %v548_v22 = vadd.f32 %v982_v5, %v1510_v26 }
 0x13f   : > { %v475_v9 = vpop.f32.mrf.mxu0  ;;  %v539_v10 = vpop.f32.mrf.mxu1 }
 0x140   : > { %1074 = vxpose.xlu0.b32.cont [5/16] %v1073_v57, 128  ;;  %v476_v11 = vadd.f32 %v1510_v26, %v475_v9  ;;  %v540_v12 = vadd.f32 %v1510_v26, %v539_v10  ;;  %v1087_v29 = vpack.i.bf16 %v548_v22, %v484_v21 }
 0x141   : > { %v969_v14 = vpop.f32.mrf.mxu0  ;;  %v985_v15 = vpop.f32.mrf.mxu1 }
 0x142   : > { %v1083_v18 = vpack.i.bf16 %v540_v12, %v476_v11  ;;  %v497_v35 = vadd.f32 %v969_v14, %v1510_v26  ;;  %v561_v36 = vadd.f32 %v985_v15, %v1510_v26 }
 0x143   : > { %v488_v19 = vpop.f32.mrf.mxu0  ;;  %v552_v20 = vpop.f32.mrf.mxu1 }
 0x144   : > { %1076 = vxpose.xlu0.b32.cont [6/16] %v1075_v62, 128  ;;  %v489_v27 = vadd.f32 %v1510_v26, %v488_v19  ;;  %v553_v28 = vadd.f32 %v1510_v26, %v552_v20  ;;  %v1093_v40 = vpack.i.bf16 %v561_v36, %v497_v35 }
 0x145   : > { %v970_v24 = vpop.f32.mrf.mxu0  ;;  %v986_v25 = vpop.f32.mrf.mxu1 }
 0x146   : > { %v1089_v34 = vpack.i.bf16 %v553_v28, %v489_v27  ;;  %v500_v38 = vadd.f32 %v970_v24, %v1510_v26  ;;  %v564_v39 = vadd.f32 %v986_v25, %v1510_v26 }
 0x147   : > { %v491_v30 = vpop.f32.mrf.mxu0  ;;  %v555_v31 = vpop.f32.mrf.mxu1 }
 0x148   : > { %1078 = vxpose.xlu0.b32.cont [7/16] %v1077_v3, 128  ;;  %v492_v32 = vadd.f32 %v1510_v26, %v491_v30  ;;  %v556_v33 = vadd.f32 %v1510_v26, %v555_v31  ;;  %v1095_v41 = vpack.i.bf16 %v564_v39, %v500_v38 }
 0x14a   : > { %v1091_v37 = vpack.i.bf16 %v556_v33, %v492_v32 }
 0x14c   : > { %1080 = vxpose.xlu0.b32.cont [8/16] %v1079_v8, 128 }
 0x150   : > { %1082 = vxpose.xlu0.b32.cont [9/16] %v1081_v13, 128 }
 0x154   : > { %1084 = vxpose.xlu0.b32.cont [10/16] %v1083_v18, 128 }
 0x158   : > { %1086 = vxpose.xlu0.b32.cont [11/16] %v1085_v23, 128 }
 0x15c   : > { %1088 = vxpose.xlu0.b32.cont [12/16] %v1087_v29, 128 }
 0x160   : > { %1090 = vxpose.xlu0.b32.cont [13/16] %v1089_v34, 128 }
 0x164   : > { %1092 = vxpose.xlu0.b32.cont [14/16] %v1091_v37, 128 }
 0x168   : > { %1094 = vxpose.xlu0.b32.cont [15/16] %v1093_v40, 128 }
 0x16c   : > { %1096 = vxpose.xlu0.b32.end [16/16] %v1095_v41, 128 }
 0x1ac   : > { %v1097_v42 = vpop.trf.xlu0 }
 0x1ad   : > { %v1101_v43 = vunpack.i.h.bf16 %v1097_v42  ;;  %v1098_v44 = vunpack.i.l.bf16 %v1097_v42 }
 0x1af   : > { %v898_v45 = vpack.c.bf16 %v1101_v43, %v1098_v44 }
 0x1b0   : > { %v1102_v46 = vpop.trf.xlu0 }
 0x1b1   : > { %727 = vst [vmem:[%s1546_s28] sm:$0xff] %v898_v45  ;;  %v1106_v47 = vunpack.i.h.bf16 %v1102_v46  ;;  %v1103_v48 = vunpack.i.l.bf16 %v1102_v46 }
 0x1b3   : > { %v899_v26 = vpack.c.bf16 %v1106_v47, %v1103_v48 }
 0x1b4   : > { %v1107_v49 = vpop.trf.xlu0 }
 0x1b5   : > { %728 = vst [vmem:[%s1546_s28 + $0x8] sm:$0xff] %v899_v26  ;;  %v1111_v50 = vunpack.i.h.bf16 %v1107_v49  ;;  %v1108_v51 = vunpack.i.l.bf16 %v1107_v49 }
 0x1b7   : > { %v900_v52 = vpack.c.bf16 %v1111_v50, %v1108_v51 }
 0x1b8   : > { %v1112_v53 = vpop.trf.xlu0 }
 0x1b9   : > { %729 = vst [vmem:[%s1546_s28 + $0x10] sm:$0xff] %v900_v52  ;;  %v1116_v54 = vunpack.i.h.bf16 %v1112_v53  ;;  %v1113_v55 = vunpack.i.l.bf16 %v1112_v53 }
 0x1bb   : > { %v901_v56 = vpack.c.bf16 %v1116_v54, %v1113_v55 }
 0x1bc   : > { %v1117_v57 = vpop.trf.xlu0 }
 0x1bd   : > { %730 = vst [vmem:[%s1546_s28 + $0x18] sm:$0xff] %v901_v56  ;;  %v1121_v58 = vunpack.i.h.bf16 %v1117_v57  ;;  %v1118_v59 = vunpack.i.l.bf16 %v1117_v57 }
 0x1bf   : > { %v902_v60 = vpack.c.bf16 %v1121_v58, %v1118_v59 }
 0x1c0   : > { %v1122_v61 = vpop.trf.xlu0 }
 0x1c1   : > { %731 = vst [vmem:[%s1546_s28 + $0x20] sm:$0xff] %v902_v60  ;;  %v1126_v62 = vunpack.i.h.bf16 %v1122_v61  ;;  %v1123_v63 = vunpack.i.l.bf16 %v1122_v61 }
 0x1c3   : > { %v903_v0 = vpack.c.bf16 %v1126_v62, %v1123_v63 }
 0x1c4   : > { %v1127_v1 = vpop.trf.xlu0 }
 0x1c5   : > { %732 = vst [vmem:[%s1546_s28 + $0x28] sm:$0xff] %v903_v0  ;;  %v1131_v2 = vunpack.i.h.bf16 %v1127_v1  ;;  %v1128_v3 = vunpack.i.l.bf16 %v1127_v1 }
 0x1c7   : > { %v904_v4 = vpack.c.bf16 %v1131_v2, %v1128_v3 }
 0x1c8   : > { %v1132_v5 = vpop.trf.xlu0 }
 0x1c9   : > { %733 = vst [vmem:[%s1546_s28 + $0x30] sm:$0xff] %v904_v4  ;;  %v1136_v6 = vunpack.i.h.bf16 %v1132_v5  ;;  %v1133_v7 = vunpack.i.l.bf16 %v1132_v5 }
 0x1cb   : > { %v905_v8 = vpack.c.bf16 %v1136_v6, %v1133_v7 }
 0x1cc   : > { %v1137_v9 = vpop.trf.xlu0 }
 0x1cd   : > { %734 = vst [vmem:[%s1546_s28 + $0x38] sm:$0xff] %v905_v8  ;;  %v1141_v10 = vunpack.i.h.bf16 %v1137_v9  ;;  %v1138_v11 = vunpack.i.l.bf16 %v1137_v9 }
 0x1cf   : > { %v906_v12 = vpack.c.bf16 %v1141_v10, %v1138_v11 }
 0x1d0   : > { %v1142_v13 = vpop.trf.xlu0 }
 0x1d1   : > { %735 = vst [vmem:[%s1546_s28 + $0x40] sm:$0xff] %v906_v12  ;;  %v1146_v14 = vunpack.i.h.bf16 %v1142_v13  ;;  %v1143_v15 = vunpack.i.l.bf16 %v1142_v13 }
 0x1d3   : > { %v907_v16 = vpack.c.bf16 %v1146_v14, %v1143_v15 }
 0x1d4   : > { %v1147_v17 = vpop.trf.xlu0 }
 0x1d5   : > { %736 = vst [vmem:[%s1546_s28 + $0x48] sm:$0xff] %v907_v16  ;;  %v1151_v18 = vunpack.i.h.bf16 %v1147_v17  ;;  %v1148_v19 = vunpack.i.l.bf16 %v1147_v17 }
 0x1d7   : > { %v908_v20 = vpack.c.bf16 %v1151_v18, %v1148_v19 }
 0x1d8   : > { %v1152_v21 = vpop.trf.xlu0 }
 0x1d9   : > { %737 = vst [vmem:[%s1546_s28 + $0x50] sm:$0xff] %v908_v20  ;;  %v1156_v22 = vunpack.i.h.bf16 %v1152_v21  ;;  %v1153_v23 = vunpack.i.l.bf16 %v1152_v21 }
 0x1db   : > { %v909_v24 = vpack.c.bf16 %v1156_v22, %v1153_v23 }
 0x1dc   : > { %v1157_v25 = vpop.trf.xlu0 }
 0x1dd   : > { %738 = vst [vmem:[%s1546_s28 + $0x58] sm:$0xff] %v909_v24  ;;  %v1161_v27 = vunpack.i.h.bf16 %v1157_v25  ;;  %v1158_v28 = vunpack.i.l.bf16 %v1157_v25 }
 0x1df   : > { %v910_v29 = vpack.c.bf16 %v1161_v27, %v1158_v28 }
 0x1e0   : > { %v1162_v30 = vpop.trf.xlu0 }
 0x1e1   : > { %739 = vst [vmem:[%s1546_s28 + $0x60] sm:$0xff] %v910_v29  ;;  %v1166_v31 = vunpack.i.h.bf16 %v1162_v30  ;;  %v1163_v32 = vunpack.i.l.bf16 %v1162_v30 }
 0x1e3   : > { %v911_v33 = vpack.c.bf16 %v1166_v31, %v1163_v32 }
 0x1e4   : > { %v1167_v34 = vpop.trf.xlu0 }
 0x1e5   : > { %740 = vst [vmem:[%s1546_s28 + $0x68] sm:$0xff] %v911_v33  ;;  %v1171_v35 = vunpack.i.h.bf16 %v1167_v34  ;;  %v1168_v36 = vunpack.i.l.bf16 %v1167_v34 }
 0x1e7   : > { %v912_v37 = vpack.c.bf16 %v1171_v35, %v1168_v36 }
 0x1e8   : > { %v1172_v38 = vpop.trf.xlu0 }
 0x1e9   : > { %741 = vst [vmem:[%s1546_s28 + $0x70] sm:$0xff] %v912_v37  ;;  %v1176_v39 = vunpack.i.h.bf16 %v1172_v38  ;;  %v1173_v40 = vunpack.i.l.bf16 %v1172_v38 }
 0x1eb   : > { %v913_v41 = vpack.c.bf16 %v1176_v39, %v1173_v40 }
 0x1ed   : > { %742 = vst [vmem:[%s1546_s28 + $0x78] sm:$0xff] %v913_v41 }
 0x1ee   : > { %1268 = shalt.err (!%p1265_p0)
}
 0x1ef   : > { %s1269_s11 = scalar_lea.hbm %s1568_s4, 2048  ;;  %s1273_s30 = scalar_lea.hbm %s1617_s3, 4096 }
 0x1f0   : > { %p1270_p5 = scmp.ne.s32.totalorder %s1568_s4, %s1269_s11  ;;  %p1274_p4 = scmp.lt.s32.totalorder %s1568_s4, %s1617_s3 }
 0x1f1   : > { %p1275_p6 = scmp.lt.s32.totalorder %s1273_s30, %s1269_s11 }
 0x1f2   : > { %p1271_p2 = pnand %p1270_p5, %p1633_p11 }
 0x1f3   : > { %p1276_p8 = por %p1275_p6, %p1274_p4 }
 0x1f4   : > { %p1272_p1 = pneg %p1271_p2 }
 0x1f6   : > { %p1277_p3 = pnand %p1276_p8, %p1272_p1 }
 0x1f8   : > { %1280 = shalt.err (!%p1277_p3)
}
 0x1f9   : > { %s1330_s20 = smov 128   ;;  %s1331_s28 = smov 256  }
 0x1fa   : > { %s1332_s29 = smov 8  }
 0x1fb   : > { %1009 = dma.vmem_to_hbm [thread:$0]  (%p1633_p11), %s1570_s17, 2048, %s1568_s4, %s744_s8, %s1330_s20, %s1331_s28, %s1332_s29  }
 0x1fc PF: > { %s772_s22 = sand.u32 1, %s1311_s12   ;;  %p1634_p7 = scmp.ne.s32.totalorder %s1623_s19, 0 }
 0x1fd   : > { %p1635_p9 = scmp.ge.s32.totalorder %s1323_s15, 2  ;;  %s773_s25 = scalar_lea.sflag [#allocation4], %s772_s22 }
 0x1ff   : > { %p1020_p10 = pnand %p1635_p9, %p1634_p7 }
 0x201   : > { %p1021_p12 = pneg %p1020_p10 }
 0x203   : > { %1306 = dma.done.wait (%p1021_p12), %s773_s25, 2048  }
 0x204   : > { %1308 = vsyncadd (%p1021_p12), %s773_s25, 4294965248  ;;  %p17_p13 = scmp.ge.s32.totalorder %s1407_s24, 4   ;;  %s1636_s12 = smov %s1315_s13 }
 0x205   : > { %s1637_s13 = smov %s1319_s14  ;;  %s1638_s14 = smov %s1427_s5 }
 0x206   : > { %s1639_s15 = smov %s1407_s24  ;;  %19 = sbr.rel (!%p17_p13) target bundleno = 6 (0x6), region = 81 }
 0x20b   :  { %778 = vsyncpa [#allocation3], 1 }
 0x20c   :  { %780 = vsyncpa [#allocation3 + $0x1], 1 }
 0x20d   :  { %781 = vsyncpa [#allocation6], 1 }
 0x20e   :  { %782 = vsyncpa [#allocation4], 1 }
 0x20f   :  { %784 = vsyncpa [#allocation4 + $0x1], 1 }

</bundles_post_ra>
